<compile_context>
chip_gen: v7x
topology: tpu7x:2x2x1
jax: 0.10.0
libtpu: 0.0.40
codegen_flags: <defaults>
</compile_context>

<pallas_src>
import functools

import jax
import jax.numpy as jnp
import numpy as np
from jax import lax
from jax.experimental import pallas as pl
from jax.experimental.pallas import tpu as pltpu


# ------------------------------- kernel --------------------------------------
def _bottleneck_kernel(x_ref, s0_ref, b0_ref, w1_ref, b1_ref,
                       w2_ref, b2_ref, w3_ref, wd_ref, o_ref,
                       *, downsampling, spatial):
    H, W = spatial
    NB = x_ref.shape[0]
    WCin = x_ref.shape[2]           # W * Cin  (lane-dense)
    WC1 = w1_ref.shape[1]           # W * C1
    WC2 = w2_ref.shape[2]           # W * C2
    WCout = w3_ref.shape[1]         # W * Cout
    M = NB * H                      # matmul rows (one row per image row)
    f32, bf16 = jnp.float32, jnp.bfloat16

    # lane-dense rows: (NB, H, W*Cin) -> (NB*H, W*Cin); leading-dim merge only.
    x = x_ref[...].reshape(M, WCin)

    # --- BN1 (folded with channel_selection) + ReLU, full-lane-width VPU, f32
    h0 = jnp.maximum(x * s0_ref[...] + b0_ref[...], 0.0)

    # --- 1x1 conv Cin -> C1 as W-block-diagonal matmul (BN2 scale folded into
    #     the weight), then bias + ReLU.  bf16 operands, f32 accumulation.
    h1 = jnp.dot(h0.astype(bf16), w1_ref[...], preferred_element_type=f32)
    h1 = jnp.maximum(h1 + b1_ref[...], 0.0)                      # (M, W*C1) f32

    # --- 3x3 conv (stride 1, pad 1) as three W-block-banded matmuls (per ky).
    #     Width padding / kx taps are encoded in the banded weights; height
    #     padding is two zero rows around h1.  No im2col, no scratch, no
    #     full-buffer zeroing.
    h1_3d = h1.reshape(NB, H, WC1)
    zrow = jnp.zeros((NB, 1, WC1), f32)
    padded = jnp.concatenate([zrow, h1_3d, zrow], axis=1)        # (NB, H+2, W*C1)
    h2 = jnp.zeros((M, WC2), f32)
    for dy in range(3):                                          # static unroll
        lhs = padded[:, dy:dy + H, :].reshape(M, WC1).astype(bf16)
        h2 = h2 + jnp.dot(lhs, w2_ref[dy], preferred_element_type=f32)

    # --- BN3 bias (scale folded into w2) + ReLU
    h2 = jnp.maximum(h2 + b2_ref[...], 0.0)

    # --- final 1x1 conv C2 -> Cout (W-block-diagonal)
    out = jnp.dot(h2.astype(bf16), w3_ref[...], preferred_element_type=f32)

    # --- residual (PyTorch module downsamples the RAW input x)
    if downsampling:
        out = out + jnp.dot(x.astype(bf16), wd_ref[...],
                            preferred_element_type=f32)
    else:
        out = out + x                          # requires Cin == Cout (asserted)

    # lane-dense store: (M, W*Cout) -> (NB, H, W*Cout) -> unmasked vst
    o_ref[...] = out.reshape(NB, H, WCout).astype(o_ref.dtype)


# ------------------------- parameter preparation ------------------------------
def prepare_block_params(p, W):
    """Fold BN scales into conv weights and build the lane-dense block-diag /
    block-banded weights.  In a real network this is computed once and cached."""
    f32, bf16 = jnp.float32, jnp.bfloat16
    Cin = p["w1"].shape[0]
    C1 = p["w1"].shape[1]
    C2 = p["w2_hwio"].shape[3]

    eye = jnp.eye(W, dtype=f32)
    w1s = p["w1"] * p["s1"][None, :]                       # fold BN2 scale
    w2s = p["w2_hwio"] * p["s2"][None, None, None, :]      # fold BN3 scale

    # 1x1 convs -> W-block-diagonal weights operating on the lane-dense slab.
    w1bd = jnp.kron(eye, w1s).astype(bf16)                 # (W*Cin, W*C1)
    w3bd = jnp.kron(eye, p["w3"]).astype(bf16)             # (W*C2,  W*Cout)
    wdbd = jnp.kron(eye, p["wd"]).astype(bf16)             # (W*Cin, W*Cout)

    # 3x3 conv -> per-ky W-block-banded weights.  Block (s, w) carries tap
    # kx = s - w + 1 when |s - w| <= 1; out-of-range taps (width padding) are
    # simply absent, which is exactly what zero padding computes.
    w2band = jnp.stack([
        sum(jnp.kron(jnp.eye(W, k=1 - dx, dtype=f32), w2s[dy, dx])
            for dx in range(3))
        for dy in range(3)]).astype(bf16)                  # (3, W*C1, W*C2)

    return {
        "s0t": jnp.tile(p["s0"], W).reshape(1, W * Cin),
        "b0t": jnp.tile(p["b0"], W).reshape(1, W * Cin),
        "w1bd": w1bd,
        "b1t": jnp.tile(p["b1"], W).reshape(1, W * C1),
        "w2band": w2band,
        "b2t": jnp.tile(p["b2"], W).reshape(1, W * C2),
        "w3bd": w3bd,
        "wdbd": wdbd,
    }


# ------------------------------- wrappers -------------------------------------
def bottleneck_forward_nhwc(x_nhwc, params, *, downsampling=False, stride=1,
                            batch_block=4):
    """Kernel-native NHWC path. x_nhwc: (N, H, W, Cin) f32 -> (N, H, W, Cout)."""
    assert stride == 1, "TODO(synk): stride > 1 not supported in this kernel"
    N, H, W, Cin = x_nhwc.shape
    C1 = params["w1"].shape[1]
    C2 = params["w2_hwio"].shape[3]
    Cout = params["w3"].shape[1]
    NB = batch_block
    assert N % NB == 0, "batch must be divisible by batch_block"
    if not downsampling:
        assert Cin == Cout, "identity residual requires Cin == Cout"

    kp = prepare_block_params(params, W)   # constant folding; cache in practice

    # lane-dense HBM slab (free reshape at the XLA level)
    x_flat = x_nhwc.reshape(N, H, W * Cin)

    def fixed(a):
        r = a.ndim
        return pl.BlockSpec(a.shape, lambda n, _r=r: (0,) * _r)

    kernel = functools.partial(_bottleneck_kernel,
                               downsampling=downsampling, spatial=(H, W))

    consts = (kp["s0t"], kp["b0t"], kp["w1bd"], kp["b1t"], kp["w2band"],
              kp["b2t"], kp["w3bd"], kp["wdbd"])

    flops = 2 * N * H * W * (Cin * C1 + 9 * C1 * C2 + C2 * Cout
                             + (Cin * Cout if downsampling else 0))
    bytes_acc = (x_flat.size * x_flat.dtype.itemsize
                 + N * H * W * Cout * 4
                 + sum(int(a.size) * a.dtype.itemsize for a in consts))

    out_flat = pl.pallas_call(
        kernel,
        out_shape=jax.ShapeDtypeStruct((N, H, W * Cout), jnp.float32),
        grid=(N // NB,),
        in_specs=[pl.BlockSpec((NB, H, W * Cin), lambda n: (n, 0, 0))]
                 + [fixed(a) for a in consts],
        out_specs=pl.BlockSpec((NB, H, W * Cout), lambda n: (n, 0, 0)),
        compiler_params=pltpu.CompilerParams(
            dimension_semantics=("parallel",),
            vmem_limit_bytes=32 * 1024 * 1024),
        cost_estimate=pl.CostEstimate(flops=flops, transcendentals=0,
                                      bytes_accessed=bytes_acc),
    )(x_flat, *consts)

    return out_flat.reshape(N, H, W, Cout)


def bottleneck_forward(x_nchw, params, *, downsampling=False, stride=1,
                       batch_block=4):
    """NCHW adapter for PyTorch-interface parity (transposes disappear in a
    channels-last network; prefer bottleneck_forward_nhwc when chaining)."""
    x = jnp.transpose(x_nchw, (0, 2, 3, 1))       # NCHW -> NHWC
    out = bottleneck_forward_nhwc(x, params, downsampling=downsampling,
                                  stride=stride, batch_block=batch_block)
    return jnp.transpose(out, (0, 3, 1, 2))       # NHWC -> NCHW


# ------------------------- parameter construction ----------------------------
def _fold_bn(gamma, beta, mean, var, eps=1e-5):
    inv = 1.0 / jnp.sqrt(var + eps)
    scale = gamma * inv
    bias = beta - mean * scale
    return scale, bias


def make_params(key, in_places, places, cfg, expansion=4, downsampling=True):
    ks = jax.random.split(key, 16)
    c0, c1, c2 = cfg
    cout = places * expansion
    assert c0 == in_places

    def bn(i, c):
        gamma = 1.0 + 0.1 * jax.random.normal(ks[i], (c,), jnp.float32)
        beta = 0.1 * jax.random.normal(ks[i + 1], (c,), jnp.float32)
        mean = 0.05 * jax.random.normal(ks[i + 2], (c,), jnp.float32)
        var = 1.0 + 0.1 * jnp.abs(jax.random.normal(ks[i + 3], (c,), jnp.float32))
        return _fold_bn(gamma, beta, mean, var)

    indexes = jnp.ones((in_places,), jnp.float32)          # channel_selection
    s0, b0 = bn(0, in_places)
    s0, b0 = s0 * indexes, b0 * indexes
    s1, b1 = bn(4, c1)
    s2, b2 = bn(8, c2)

    w1 = 0.1 * jax.random.normal(ks[12], (c0, c1), jnp.float32)          # 1x1
    w2 = 0.1 * jax.random.normal(ks[13], (3, 3, c1, c2), jnp.float32)    # 3x3 HWIO
    w3 = 0.1 * jax.random.normal(ks[14], (c2, cout), jnp.float32)        # 1x1
    wd = (0.1 * jax.random.normal(ks[15], (in_places, cout), jnp.float32)
          if downsampling else jnp.zeros((in_places, cout), jnp.float32))

    return {"s0": s0, "b0": b0, "w1": w1, "s1": s1, "b1": b1,
            "w2_hwio": w2, "s2": s2, "b2": b2, "w3": w3, "wd": wd}


# ------------------------------ reference ------------------------------------
def bottleneck_reference(x_nchw, p, *, downsampling):
    """Pure-JAX reference with the SAME precision policy as the kernel:
    BN scales folded into bf16 conv weights, f32 accumulation, f32 elementwise."""
    bf16, f32 = jnp.bfloat16, jnp.float32
    x = jnp.transpose(x_nchw, (0, 2, 3, 1))                  # NHWC
    h0 = jnp.maximum(x * p["s0"] + p["b0"], 0.0)
    w1s = (p["w1"] * p["s1"][None, :]).astype(bf16)
    h1 = jnp.einsum("nhwc,cd->nhwd", h0.astype(bf16), w1s,
                    preferred_element_type=f32)
    h1 = jnp.maximum(h1 + p["b1"], 0.0)
    w2s = (p["w2_hwio"] * p["s2"][None, None, None, :]).astype(bf16)
    h2 = lax.conv_general_dilated(
        h1.astype(bf16), w2s, window_strides=(1, 1), padding=((1, 1), (1, 1)),
        dimension_numbers=("NHWC", "HWIO", "NHWC"),
        preferred_element_type=f32)
    h2 = jnp.maximum(h2 + p["b2"], 0.0)
    out = jnp.einsum("nhwc,cd->nhwd", h2.astype(bf16), p["w3"].astype(bf16),
                     preferred_element_type=f32)
    res = (jnp.einsum("nhwc,cd->nhwd", x.astype(bf16), p["wd"].astype(bf16),
                      preferred_element_type=f32)
           if downsampling else x)
    return jnp.transpose(out + res, (0, 3, 1, 2))            # NCHW


if __name__ == "__main__":
    key = jax.random.PRNGKey(0)
    kx, kp = jax.random.split(key)

    # Small config consistent with the module's __init__ (W*Cin=128, W*Cout=256
    # so the lane-dense slabs are exact multiples of 128 lanes).
    in_places, places, expansion = 16, 8, 4
    cfg = [16, 8, 8]                     # cfg[0] = in_places
    downsampling = True                  # Cin=16 -> Cout=32 needs the downsample
    N, H, W = 8, 8, 8                    # batch_block=4 -> grid=(2,), even for v7x

    x = jax.random.normal(kx, (N, in_places, H, W), jnp.float32)   # NCHW
    params = make_params(kp, in_places, places, cfg, expansion, downsampling)

    out = bottleneck_forward(x, params, downsampling=downsampling, stride=1,
                             batch_block=4)
    out = jax.block_until_ready(out)

    ref = jax.block_until_ready(
        bottleneck_reference(x, params, downsampling=downsampling))

    assert out.shape == (N, places * expansion, H, W)
    np.testing.assert_allclose(np.asarray(out, dtype=np.float32),
                               np.asarray(ref, dtype=np.float32),
                               rtol=2e-2, atol=2e-2)
    print("KERNEL_OK")
</pallas_src>

<mosaic_0001>
module attributes {stable_mosaic.version = 11 : i64} {
  func.func @_bottleneck_kernel(%arg0: i32, %arg1: memref<4x8x128xf32, #tpu.memory_space<vmem>>, %arg2: memref<1x128xf32, #tpu.memory_space<vmem>>, %arg3: memref<1x128xf32, #tpu.memory_space<vmem>>, %arg4: memref<128x64xbf16, #tpu.memory_space<vmem>>, %arg5: memref<1x64xf32, #tpu.memory_space<vmem>>, %arg6: memref<3x64x64xbf16, #tpu.memory_space<vmem>>, %arg7: memref<1x64xf32, #tpu.memory_space<vmem>>, %arg8: memref<64x256xbf16, #tpu.memory_space<vmem>>, %arg9: memref<128x256xbf16, #tpu.memory_space<vmem>>, %arg10: memref<4x8x256xf32, #tpu.memory_space<vmem>>) attributes {dimension_semantics = [#tpu.dimension_semantics<parallel>], iteration_bounds = array<i64: 2>, scalar_prefetch = 0 : i64, scratch_operands = 0 : i64, tpu.core_type = #tpu.core_type<tc>, window_params = [{transform_indices = @transform_0, window_bounds = array<i64: 4, 8, 128>}, {pipeline_mode = #tpu.pipeline_mode<synchronous>, transform_indices = @transform_1, window_bounds = array<i64: 1, 128>}, {pipeline_mode = #tpu.pipeline_mode<synchronous>, transform_indices = @transform_2, window_bounds = array<i64: 1, 128>}, {pipeline_mode = #tpu.pipeline_mode<synchronous>, transform_indices = @transform_3, window_bounds = array<i64: 128, 64>}, {pipeline_mode = #tpu.pipeline_mode<synchronous>, transform_indices = @transform_4, window_bounds = array<i64: 1, 64>}, {pipeline_mode = #tpu.pipeline_mode<synchronous>, transform_indices = @transform_5, window_bounds = array<i64: 3, 64, 64>}, {pipeline_mode = #tpu.pipeline_mode<synchronous>, transform_indices = @transform_6, window_bounds = array<i64: 1, 64>}, {pipeline_mode = #tpu.pipeline_mode<synchronous>, transform_indices = @transform_7, window_bounds = array<i64: 64, 256>}, {pipeline_mode = #tpu.pipeline_mode<synchronous>, transform_indices = @transform_8, window_bounds = array<i64: 128, 256>}, {transform_indices = @transform_9, window_bounds = array<i64: 4, 8, 256>}]} {
    %c0 = arith.constant 0 : index
    %c0_0 = arith.constant 0 : index
    %c0_1 = arith.constant 0 : index
    %0 = vector.load %arg1[%c0, %c0_0, %c0_1] : memref<4x8x128xf32, #tpu.memory_space<vmem>>, vector<4x8x128xf32>
    %1 = vector.shape_cast %0 : vector<4x8x128xf32> to vector<32x128xf32>
    %c0_2 = arith.constant 0 : index
    %c0_3 = arith.constant 0 : index
    %2 = vector.load %arg2[%c0_2, %c0_3] : memref<1x128xf32, #tpu.memory_space<vmem>>, vector<1x128xf32>
    %3 = vector.broadcast %2 : vector<1x128xf32> to vector<32x128xf32>
    %4 = arith.mulf %1, %3 : vector<32x128xf32>
    %c0_4 = arith.constant 0 : index
    %c0_5 = arith.constant 0 : index
    %5 = vector.load %arg3[%c0_4, %c0_5] : memref<1x128xf32, #tpu.memory_space<vmem>>, vector<1x128xf32>
    %6 = vector.broadcast %5 : vector<1x128xf32> to vector<32x128xf32>
    %7 = arith.addf %4, %6 : vector<32x128xf32>
    %cst = arith.constant 0.000000e+00 : f32
    %8 = vector.broadcast %cst : f32 to vector<32x128xf32>
    %9 = arith.maximumf %7, %8 : vector<32x128xf32>
    %10 = arith.truncf %9 : vector<32x128xf32> to vector<32x128xbf16>
    %c0_6 = arith.constant 0 : index
    %c0_7 = arith.constant 0 : index
    %11 = vector.load %arg4[%c0_6, %c0_7] : memref<128x64xbf16, #tpu.memory_space<vmem>>, vector<128x64xbf16>
    %cst_8 = arith.constant dense<0.000000e+00> : vector<32x64xf32>
    %12 = tpu.matmul %10, %11, %cst_8 {dimension_numbers = #tpu.dot_dimension_numbers<[1], [0], [0], [1], [0, 0, 1, 1], [], []>} : vector<32x128xbf16>, vector<128x64xbf16>, vector<32x64xf32> -> vector<32x64xf32>
    %c0_9 = arith.constant 0 : index
    %c0_10 = arith.constant 0 : index
    %13 = vector.load %arg5[%c0_9, %c0_10] : memref<1x64xf32, #tpu.memory_space<vmem>>, vector<1x64xf32>
    %14 = vector.broadcast %13 : vector<1x64xf32> to vector<32x64xf32>
    %15 = arith.addf %12, %14 : vector<32x64xf32>
    %cst_11 = arith.constant 0.000000e+00 : f32
    %16 = vector.broadcast %cst_11 : f32 to vector<32x64xf32>
    %17 = arith.maximumf %15, %16 : vector<32x64xf32>
    %18 = vector.shape_cast %17 : vector<32x64xf32> to vector<4x8x64xf32>
    %cst_12 = arith.constant 0.000000e+00 : f32
    %19 = vector.broadcast %cst_12 : f32 to vector<4x1x64xf32>
    %20 = tpu.concatenate %19, %18, %19 in 1 : vector<4x1x64xf32>, vector<4x8x64xf32>, vector<4x1x64xf32> -> vector<4x10x64xf32>
    %cst_13 = arith.constant 0.000000e+00 : f32
    %21 = vector.broadcast %cst_13 : f32 to vector<32x64xf32>
    %22 = vector.extract_strided_slice %20 {offsets = [0, 0, 0], sizes = [4, 8, 64], strides = [1, 1, 1]} : vector<4x10x64xf32> to vector<4x8x64xf32>
    %23 = vector.shape_cast %22 : vector<4x8x64xf32> to vector<32x64xf32>
    %24 = arith.truncf %23 : vector<32x64xf32> to vector<32x64xbf16>
    %c0_14 = arith.constant 0 : index
    %c0_15 = arith.constant 0 : index
    %c0_16 = arith.constant 0 : index
    %25 = vector.load %arg6[%c0_14, %c0_15, %c0_16] : memref<3x64x64xbf16, #tpu.memory_space<vmem>>, vector<1x64x64xbf16>
    %26 = vector.shape_cast %25 : vector<1x64x64xbf16> to vector<64x64xbf16>
    %cst_17 = arith.constant dense<0.000000e+00> : vector<32x64xf32>
    %27 = tpu.matmul %24, %26, %cst_17 {dimension_numbers = #tpu.dot_dimension_numbers<[1], [0], [0], [1], [0, 0, 1, 1], [], []>} : vector<32x64xbf16>, vector<64x64xbf16>, vector<32x64xf32> -> vector<32x64xf32>
    %28 = arith.addf %21, %27 : vector<32x64xf32>
    %29 = vector.extract_strided_slice %20 {offsets = [0, 1, 0], sizes = [4, 8, 64], strides = [1, 1, 1]} : vector<4x10x64xf32> to vector<4x8x64xf32>
    %30 = vector.shape_cast %29 : vector<4x8x64xf32> to vector<32x64xf32>
    %31 = arith.truncf %30 : vector<32x64xf32> to vector<32x64xbf16>
    %c1 = arith.constant 1 : index
    %c0_18 = arith.constant 0 : index
    %c0_19 = arith.constant 0 : index
    %32 = vector.load %arg6[%c1, %c0_18, %c0_19] : memref<3x64x64xbf16, #tpu.memory_space<vmem>>, vector<1x64x64xbf16>
    %33 = vector.shape_cast %32 : vector<1x64x64xbf16> to vector<64x64xbf16>
    %cst_20 = arith.constant dense<0.000000e+00> : vector<32x64xf32>
    %34 = tpu.matmul %31, %33, %cst_20 {dimension_numbers = #tpu.dot_dimension_numbers<[1], [0], [0], [1], [0, 0, 1, 1], [], []>} : vector<32x64xbf16>, vector<64x64xbf16>, vector<32x64xf32> -> vector<32x64xf32>
    %35 = arith.addf %28, %34 : vector<32x64xf32>
    %36 = vector.extract_strided_slice %20 {offsets = [0, 2, 0], sizes = [4, 8, 64], strides = [1, 1, 1]} : vector<4x10x64xf32> to vector<4x8x64xf32>
    %37 = vector.shape_cast %36 : vector<4x8x64xf32> to vector<32x64xf32>
    %38 = arith.truncf %37 : vector<32x64xf32> to vector<32x64xbf16>
    %c2 = arith.constant 2 : index
    %c0_21 = arith.constant 0 : index
    %c0_22 = arith.constant 0 : index
    %39 = vector.load %arg6[%c2, %c0_21, %c0_22] : memref<3x64x64xbf16, #tpu.memory_space<vmem>>, vector<1x64x64xbf16>
    %40 = vector.shape_cast %39 : vector<1x64x64xbf16> to vector<64x64xbf16>
    %cst_23 = arith.constant dense<0.000000e+00> : vector<32x64xf32>
    %41 = tpu.matmul %38, %40, %cst_23 {dimension_numbers = #tpu.dot_dimension_numbers<[1], [0], [0], [1], [0, 0, 1, 1], [], []>} : vector<32x64xbf16>, vector<64x64xbf16>, vector<32x64xf32> -> vector<32x64xf32>
    %42 = arith.addf %35, %41 : vector<32x64xf32>
    %c0_24 = arith.constant 0 : index
    %c0_25 = arith.constant 0 : index
    %43 = vector.load %arg7[%c0_24, %c0_25] : memref<1x64xf32, #tpu.memory_space<vmem>>, vector<1x64xf32>
    %44 = vector.broadcast %43 : vector<1x64xf32> to vector<32x64xf32>
    %45 = arith.addf %42, %44 : vector<32x64xf32>
    %cst_26 = arith.constant 0.000000e+00 : f32
    %46 = vector.broadcast %cst_26 : f32 to vector<32x64xf32>
    %47 = arith.maximumf %45, %46 : vector<32x64xf32>
    %48 = arith.truncf %47 : vector<32x64xf32> to vector<32x64xbf16>
    %c0_27 = arith.constant 0 : index
    %c0_28 = arith.constant 0 : index
    %49 = vector.load %arg8[%c0_27, %c0_28] : memref<64x256xbf16, #tpu.memory_space<vmem>>, vector<64x256xbf16>
    %cst_29 = arith.constant dense<0.000000e+00> : vector<32x256xf32>
    %50 = tpu.matmul %48, %49, %cst_29 {dimension_numbers = #tpu.dot_dimension_numbers<[1], [0], [0], [1], [0, 0, 1, 1], [], []>} : vector<32x64xbf16>, vector<64x256xbf16>, vector<32x256xf32> -> vector<32x256xf32>
    %51 = arith.truncf %1 : vector<32x128xf32> to vector<32x128xbf16>
    %c0_30 = arith.constant 0 : index
    %c0_31 = arith.constant 0 : index
    %52 = vector.load %arg9[%c0_30, %c0_31] : memref<128x256xbf16, #tpu.memory_space<vmem>>, vector<128x256xbf16>
    %cst_32 = arith.constant dense<0.000000e+00> : vector<32x256xf32>
    %53 = tpu.matmul %51, %52, %cst_32 {dimension_numbers = #tpu.dot_dimension_numbers<[1], [0], [0], [1], [0, 0, 1, 1], [], []>} : vector<32x128xbf16>, vector<128x256xbf16>, vector<32x256xf32> -> vector<32x256xf32>
    %54 = arith.addf %50, %53 : vector<32x256xf32>
    %55 = vector.shape_cast %54 : vector<32x256xf32> to vector<4x8x256xf32>
    %c0_33 = arith.constant 0 : index
    %c0_34 = arith.constant 0 : index
    %c0_35 = arith.constant 0 : index
    %56 = vector.load %arg10[%c0_33, %c0_34, %c0_35] : memref<4x8x256xf32, #tpu.memory_space<vmem>>, vector<4x8x256xf32>
    tpu.vector_store %arg10[%c0_33, %c0_34, %c0_35], %55 {strides = array<i32>} : memref<4x8x256xf32, #tpu.memory_space<vmem>>, vector<4x8x256xf32>,
    return
  }
  func.func @transform_0(%arg0: i32) -> (i32, i32, i32) {
    %c0_i32 = arith.constant 0 : i32
    %c0_i32_0 = arith.constant 0 : i32
    %c0_i32_1 = arith.constant 0 : i32
    return %arg0, %c0_i32, %c0_i32_0 : i32, i32, i32
  }
  func.func @transform_1(%arg0: i32) -> (i32, i32) {
    %c0_i32 = arith.constant 0 : i32
    %c0_i32_0 = arith.constant 0 : i32
    %c0_i32_1 = arith.constant 0 : i32
    return %c0_i32, %c0_i32_0 : i32, i32
  }
  func.func @transform_2(%arg0: i32) -> (i32, i32) {
    %c0_i32 = arith.constant 0 : i32
    %c0_i32_0 = arith.constant 0 : i32
    %c0_i32_1 = arith.constant 0 : i32
    return %c0_i32, %c0_i32_0 : i32, i32
  }
  func.func @transform_3(%arg0: i32) -> (i32, i32) {
    %c0_i32 = arith.constant 0 : i32
    %c0_i32_0 = arith.constant 0 : i32
    %c0_i32_1 = arith.constant 0 : i32
    return %c0_i32, %c0_i32_0 : i32, i32
  }
  func.func @transform_4(%arg0: i32) -> (i32, i32) {
    %c0_i32 = arith.constant 0 : i32
    %c0_i32_0 = arith.constant 0 : i32
    %c0_i32_1 = arith.constant 0 : i32
    return %c0_i32, %c0_i32_0 : i32, i32
  }
  func.func @transform_5(%arg0: i32) -> (i32, i32, i32) {
    %c0_i32 = arith.constant 0 : i32
    %c0_i32_0 = arith.constant 0 : i32
    %c0_i32_1 = arith.constant 0 : i32
    %c0_i32_2 = arith.constant 0 : i32
    return %c0_i32, %c0_i32_0, %c0_i32_1 : i32, i32, i32
  }
  func.func @transform_6(%arg0: i32) -> (i32, i32) {
    %c0_i32 = arith.constant 0 : i32
    %c0_i32_0 = arith.constant 0 : i32
    %c0_i32_1 = arith.constant 0 : i32
    return %c0_i32, %c0_i32_0 : i32, i32
  }
  func.func @transform_7(%arg0: i32) -> (i32, i32) {
    %c0_i32 = arith.constant 0 : i32
    %c0_i32_0 = arith.constant 0 : i32
    %c0_i32_1 = arith.constant 0 : i32
    return %c0_i32, %c0_i32_0 : i32, i32
  }
  func.func @transform_8(%arg0: i32) -> (i32, i32) {
    %c0_i32 = arith.constant 0 : i32
    %c0_i32_0 = arith.constant 0 : i32
    %c0_i32_1 = arith.constant 0 : i32
    return %c0_i32, %c0_i32_0 : i32, i32
  }
  func.func @transform_9(%arg0: i32) -> (i32, i32, i32) {
    %c0_i32 = arith.constant 0 : i32
    %c0_i32_0 = arith.constant 0 : i32
    %c0_i32_1 = arith.constant 0 : i32
    return %arg0, %c0_i32, %c0_i32_0 : i32, i32, i32
  }
}

</mosaic_0001>

<bundles_post_ra>
// kernel: tpu_custom_call.1
= control target key start
LH: loop header
LB: loop body
LE: loop exit
PB: predicated region body
PF: predicated region fallthrough
CT: control target
= control target key end

     0   :  { %14 = vsyncpa [#allocation3], 0  ;;  %s2177_s0 = inlined_call_operand.hbm [shape: f32[8,8,128], index: 0, kind: input, shape index: {}]   ;;  %s2178_s1 = inlined_call_operand.vmem [shape: f32[1,128], index: 1, kind: input, shape index: {}]   ;;  %s2179_s2 = inlined_call_operand.vmem [shape: f32[1,128], index: 2, kind: input, shape index: {}]   ;;  %s2180_s3 = inlined_call_operand.vmem [shape: bf16[128,64], index: 3, kind: input, shape index: {}]   ;;  %s2181_s4 = inlined_call_operand.vmem [shape: f32[1,64], index: 4, kind: input, shape index: {}]   ;;  %s2182_s5 = inlined_call_operand.vmem [shape: bf16[3,64,64], index: 5, kind: input, shape index: {}]   ;;  %s2183_s6 = inlined_call_operand.vmem [shape: f32[1,64], index: 6, kind: input, shape index: {}]   ;;  %s2184_s7 = inlined_call_operand.hbm [shape: bf16[64,256], index: 7, kind: input, shape index: {}]   ;;  %s2185_s8 = inlined_call_operand.hbm [shape: bf16[128,256], index: 8, kind: input, shape index: {}]   ;;  %s2186_s9 = inlined_call_operand.hbm [shape: f32[8,8,256], index: 9, kind: output, shape index: {}]  }
   0x1   :  { %16 = vsyncpa [#allocation3 + $0x1], 0 }
   0x2   :  { %17 = vsyncpa [#allocation6], 0 }
   0x3   :  { %18 = vsyncpa [#allocation4], 0 }
   0x4   :  { %20 = vsyncpa [#allocation4 + $0x1], 0  ;;  %s1805_s30 = smov 0   ;;  %s1807_s10 = smov 0  }
   0x5   :  { %s1809_s11 = smov 0   ;;  %s1811_s12 = smov 0  }
   0x6 LB: > { %s1826_s13 = sadd.s32 4294967295, %s1744_s12   ;;  %s1266_s14 = sadd.s32 4294967294, %s1744_s12   ;;  %s1744_s12 = sphi %s1811_s12, %s2213_s12   ;;  %s1740_s11 = sphi %s1809_s11, %s2212_s11   ;;  %s1736_s10 = sphi %s1807_s10, %s2211_s10   ;;  %s1732_s30 = sphi %s1805_s30, %s2210_s30  }
   0x7   : > { %p46_p0 = scmp.ne.s32.totalorder %s1736_s10, %s1732_s30  ;;  %p2187_p1 = scmp.eq.s32.totalorder %s1826_s13, 0 }
   0x8   : > { %p244_p3 = scmp.eq.s32.totalorder %s1266_s14, 1  ;;  %p1267_p5 = scmp.ge.s32.totalorder %s1744_s12, 1 }
   0x9   : > { %p1835_p4 = por %p2187_p1, %p46_p0  ;;  %p251_p7 = scmp.lt.s32.totalorder %s1744_s12, 3 }
   0xa   : > { %p1840_p6 = por %p244_p3, %p46_p0  ;;  %s1746_s18 = smov [#allocation5]  }
   0xb   : > { %s2193_s15 = scalar_select %p1835_p4, 1, 0 }
   0xc   : > { %s2194_s16 = scalar_select %p1840_p6, 1, 0 }
   0xd   : > { %p1845_p8 = pnand %p1267_p5, %p251_p7  ;;  %s281_s19 = sshll.u32 %s1746_s18, 4  ;;  %s1849_s19 = int_to_ptr.vmem [resolvable:$true] %s281_s19 }
   0xe   : > { %2195 = sst [smem:[#allocation12_spill]] %s2194_s16  ;;  %s1747_s21 = smov [#allocation7]  }
   0xf   : > { %p1472_p9 = pneg %p1845_p8  ;;  %s294_s22 = sshll.u32 %s1747_s21, 4  ;;  %s1860_s22 = int_to_ptr.vmem [resolvable:$true] %s294_s22 }
  0x10   : > { %s1588_s25 = scalar_lea.hbm %s2184_s7, 1024 }
  0x11   : > { %p1856_p11 = pnand %p1472_p9, %p2187_p1  ;;  %p1589_p12 = scmp.ne.s32.totalorder %s2184_s7, %s1588_s25 }
  0x12   : > { %p1595_p5 = scmp.lt.u32.totalorder %s1588_s25, %s2184_s7 }
  0x13   : > { %p1590_p13 = pneg %p1856_p11 }
  0x15   : > { %p1591_p0 = pnand %p1590_p13, %p1589_p12 }
  0x17   : > { %p1592_p3 = pneg %p1591_p0 }
  0x19   : > { %p1597_p7 = pnand %p1595_p5, %p1592_p3 }
  0x1b   : > { %1600 = shalt.err (!%p1597_p7)
}
  0x1c   : > { %s1601_s14 = scalar_lea.vmem %s1849_s19, 1024  ;;  %p1609_p2 = scmp.lt.s32.totalorder %s1849_s19, %s1849_s19 }
  0x1d   : > { %p1602_p9 = scmp.ne.s32.totalorder %s1849_s19, %s1601_s14  ;;  %p1610_p12 = scmp.lt.s32.totalorder %s1601_s14, %s1601_s14 }
  0x1f   : > { %p1604_p10 = pnand %p1602_p9, %p1590_p13  ;;  %p1611_p0 = por %p1610_p12, %p1609_p2 }
  0x21   : > { %p1605_p1 = pneg %p1604_p10 }
  0x23   : > { %p1612_p6 = pnand %p1611_p0, %p1605_p1 }
  0x25   : > { %1615 = shalt.err (!%p1612_p6)
}
  0x26   : > { %s2189_s18 = smov 128   ;;  %s2190_s21 = smov 8  }
  0x27   : > { %1475 = dma.hbm_to_vmem [thread:$0]  (!%p1856_p11), %s2184_s7, 1024, %s1849_s19, [#allocation6], %s2189_s18, %s2189_s18, %s2190_s21  }
  0x28   : > { %s1616_s27 = scalar_lea.hbm %s2185_s8, 2048 }
  0x29   : > { %p1617_p1 = scmp.ne.s32.totalorder %s2185_s8, %s1616_s27  ;;  %p1623_p10 = scmp.lt.u32.totalorder %s1616_s27, %s2185_s8 }
  0x2b   : > { %p1619_p2 = pnand %p1617_p1, %p1590_p13 }
  0x2d   : > { %p1620_p6 = pneg %p1619_p2 }
  0x2f   : > { %p1625_p3 = pnand %p1623_p10, %p1620_p6 }
  0x31   : > { %1628 = shalt.err (!%p1625_p3)
}
  0x32   : > { %s1629_s19 = scalar_lea.vmem %s1860_s22, 2048  ;;  %p1637_p12 = scmp.lt.s32.totalorder %s1860_s22, %s1860_s22 }
  0x33   : > { %p1630_p5 = scmp.ne.s32.totalorder %s1860_s22, %s1629_s19  ;;  %p1638_p0 = scmp.lt.s32.totalorder %s1629_s19, %s1629_s19 }
  0x35   : > { %p1632_p7 = pnand %p1630_p5, %p1590_p13  ;;  %p1639_p1 = por %p1638_p0, %p1637_p12 }
  0x37   : > { %p1633_p9 = pneg %p1632_p7 }
  0x39   : > { %p1640_p2 = pnand %p1639_p1, %p1633_p9 }
  0x3b   : > { %1643 = shalt.err (!%p1640_p2)
}
  0x3c   : > { %1478 = dma.hbm_to_vmem [thread:$0]  (!%p1856_p11), %s2185_s8, 2048, %s1860_s22, [#allocation6], %s2189_s18, %s2189_s18, %s2190_s21  }
  0x3d   : > { %s1921_s20 = sadd.s32 1, %s1744_s12   ;;  %s33_s24 = sadd.s32 1, %s1740_s11 }
  0x3e   : > { %s30_s25 = ssub.s32 %s1744_s12, %s1921_s20  ;;  %p40_p13 = scmp.ne.s32.totalorder %s1740_s11, %s1736_s10 }
  0x3f   : > { %p31_p6 = scmp.eq.s32.totalorder %s30_s25, 0  ;;  %p41_p10 = scmp.eq.s32.totalorder %s1744_s12, 0 }
  0x40   : > { %p2198_p3 = scmp.eq.s32.totalorder %s1826_s13, 1  ;;  %p1489_p7 = scmp.lt.s32.totalorder %s1744_s12, 2 }
  0x41   : > { %s1937_s27 = scalar_select %p31_p6, %s1740_s11, %s33_s24  }
  0x42   : > { %p1931_p5 = por %p2198_p3, %p40_p13  ;;  %p42_p9 = por %p41_p10, %p40_p13 }
  0x43   : > { %s308_s28 = sand.u32 1, %s1740_s11   ;;  %s1357_s22 = sshll.u32 %s1744_s12, 9 }
  0x44   : > { %s2199_s26 = scalar_select %p1931_p5, 1, 0 }
  0x45   : > { %s1271_s29 = sshll.u32 %s308_s28, 5  ;;  %s1944_s16 = scalar_lea.hbm %s2177_s0, %s1357_s22 }
  0x46   : > { %s312_s23 = scalar_lea.vmem [#allocation2], %s1271_s29  ;;  %p1948_p11 = pnand %p1489_p7, %p42_p9 }
  0x47   : > { %s319_s25 = sshll.u32 %s312_s23, 4  ;;  %s1952_s18 = scalar_lea.sflag [#allocation3], %s308_s28  ;;  %s1946_s25 = int_to_ptr.vmem [resolvable:$true] %s319_s25 }
  0x48   : > { %s1644_s21 = scalar_lea.hbm %s1944_s16, 512  ;;  %p1646_p0 = pneg %p1948_p11 }
  0x49   : > { %p1645_p12 = scmp.ne.s32.totalorder %s1944_s16, %s1644_s21  ;;  %s1649_s14 = scalar_lea.hbm %s2177_s0, 1024 }
  0x4a   : > { %p1650_p13 = scmp.lt.u32.totalorder %s1944_s16, %s2177_s0  ;;  %p1651_p6 = scmp.lt.u32.totalorder %s1649_s14, %s1644_s21 }
  0x4b   : > { %p1647_p1 = pnand %p1646_p0, %p1645_p12  ;;  %p1653_p3 = scmp.lt.u32.totalorder %s1644_s21, %s1944_s16 }
  0x4c   : > { %p1652_p10 = por %p1651_p6, %p1650_p13 }
  0x4d   : > { %p1648_p2 = pneg %p1647_p1 }
  0x4e   : > { %p1654_p7 = por %p1653_p3, %p1652_p10 }
  0x50   : > { %p1655_p9 = pnand %p1654_p7, %p1648_p2 }
  0x52   : > { %1658 = shalt.err (!%p1655_p9)
}
  0x53   : > { %s1659_s28 = scalar_lea.vmem %s1946_s25, 512  ;;  %s1750_s29 = smov [#allocation2]  }
  0x54   : > { %p1660_p12 = scmp.ne.s32.totalorder %s1946_s25, %s1659_s28  ;;  %s1664_s22 = sshll.u32 %s1750_s29, 4  ;;  %s1665_s22 = int_to_ptr.vmem [resolvable:$false] %s1664_s22 }
  0x55   : > { %s1666_s19 = scalar_lea.vmem %s1665_s22, 1024  ;;  %p1667_p4 = scmp.lt.s32.totalorder %s1946_s25, %s1665_s22 }
  0x56   : > { %p1662_p1 = pnand %p1660_p12, %p1646_p0  ;;  %p1668_p13 = scmp.lt.s32.totalorder %s1666_s19, %s1659_s28 }
  0x58   : > { %p1663_p5 = pneg %p1662_p1  ;;  %p1669_p6 = por %p1668_p13, %p1667_p4 }
  0x5a   : > { %p1670_p10 = pnand %p1669_p6, %p1663_p5 }
  0x5c   : > { %1673 = shalt.err (!%p1670_p10)
}
  0x5d   : > { %s2201_s21 = smov 8   ;;  %s2202_s14 = smov 128  }
  0x5e   : > { %1482 = dma.hbm_to_vmem [thread:$0]  (!%p1948_p11), %s1944_s16, 512, %s1946_s25, %s1952_s18, %s2202_s14, %s2202_s14, %s2201_s21  }
  0x5f   : > { %331 = sbr.rel (%p1845_p8) target bundleno = 864 (0x360), region = 56  ;;  %s1986_s23 = sand.u32 (!%p1845_p8), 1, %s1736_s10  }
  0x60   : > { %s1275_s28 = sshll.u32 (!%p1845_p8), %s1986_s23, 5  ;;  %s334_s29 = scalar_lea.sflag (!%p1845_p8), [#allocation3], %s1986_s23 }
  0x61   : > { %s1990_s22 = scalar_lea.vmem (!%p1845_p8), [#allocation2], %s1275_s28  ;;  %p2203_p4 = scmp.ne.s32.totalorder (!%p1845_p8), %s2193_s15, 0 }
  0x66   : > { %1719 = dma.done.wait (%p2203_p4), %s334_s29, 512  }
  0x67   : > { %1721 = vsyncadd (%p2203_p4), %s334_s29, 4294966784  ;;  %p2204_p5 = scmp.eq.s32.totalorder %s1826_s13, 0 }
  0x69   : > { %1723 = dma.done.wait (%p2204_p5), [#allocation6], 3072   ;;  %p2205_p8 = pmov %p2204_p5 }
  0x6a   : > { %v1532_v0 = vld [vmem:[%s2180_s3] sm:$0xff]   ;;  %v1533_v1 = vld [vmem:[%s2180_s3 + $0x8] sm:$0xff]   ;;  %v1534_v2 = vld [vmem:[%s2180_s3 + $0x10] sm:$0xff]   ;;  %vm551_vm0 = vcmask 1040384   ;;  %vm765_vm1 = vcmask 1045504   ;;  %vm578_vm2 = vcmask 1046528  }
  0x6b   : > { %1725 = vsyncadd (%p2205_p8), [#allocation6], 4294964224  ;;  %1388 = vmatprep.subr.bf16.mxu0 %v1532_v0  ;;  %v1535_v3 = vld [vmem:[%s2180_s3 + $0x18] sm:$0xff]   ;;  %v2013_v4 = vld [vmem:[%s1990_s22] sm:$0xff]  ;;  %vm630_vm3 = vcmask 523264   ;;  %s1278_s18 = sshll.u32 %s1986_s23, 6 }
  0x6c   : > { %1389 = vmatpush3.bf16.msra.mxu0 %v1532_v0  ;;  %v2016_v5 = vld [vmem:[%s1990_s22 + $0x8] sm:$0xff]  ;;  %v1279_v6 = vld [vmem:[%s2178_s1] ss:$0 sm:$0xff]  ;;  %v2032_v16 = vld [vmem:[%s1990_s22 + $0x10] sm:$0xff]  ;;  %s379_s16 = scalar_lea.vmem [#allocation8], %s1278_s18  ;;  %s1359_s15 = sshll.u32 %s1826_s13, 10 }
  0x6d   : > { %1390 = vmatprep.subr.bf16.mxu0 %v1533_v1  ;;  %v394_v7 = vmul.f32 %v1279_v6, %v2013_v4  ;;  %v395_v8 = vmul.f32 %v1279_v6, %v2016_v5  ;;  %v1280_v9 = vld [vmem:[%s2179_s2] ss:$0 sm:$0xff]  ;;  %v901_v10 = vpack.c.bf16 %v2016_v5, %v2013_v4  ;;  %v1537_v17 = vld [vmem:[%s2180_s3 + $0x28] sm:$0xff]   ;;  %v2038_v18 = vld [vmem:[%s1990_s22 + $0x18] sm:$0xff]  ;;  %v396_v21 = vmul.f32 %v1279_v6, %v2032_v16  ;;  %s1174_s25 = sshll.u32 %s379_s16, 4  ;;  %s2133_s21 = scalar_lea.hbm %s2186_s9, %s1359_s15  ;;  %s2128_s25 = int_to_ptr.vmem [resolvable:$true] %s1174_s25 }
  0x6e   : > { %v1536_v11 = vld [vmem:[%s2180_s3 + $0x20] sm:$0xff]   ;;  %v1538_v20 = vld [vmem:[%s2180_s3 + $0x30] sm:$0xff]   ;;  %v397_v22 = vmul.f32 %v1279_v6, %v2038_v18  ;;  %v1539_v23 = vld [vmem:[%s2180_s3 + $0x38] sm:$0xff]   ;;  %s1160_s13 = scalar_lea.sflag [#allocation4], %s1986_s23  ;;  %s1674_s14 = scalar_lea.vmem %s2128_s25, 1024 }
  0x6f   : > { %v405_v12 = vadd.f32 %v1280_v9, %v394_v7  ;;  %v406_v13 = vadd.f32 %v1280_v9, %v395_v8  ;;  %v407_v24 = vadd.f32 %v1280_v9, %v396_v21  ;;  %v1540_v29 = vld [vmem:[%s2182_s5 + $0x20] sm:$0xff]   ;;  %v1541_v30 = vld [vmem:[%s2182_s5 + $0x28] sm:$0xff]   ;;  %v1542_v31 = vld [vmem:[%s2182_s5 + $0x30] sm:$0xff]   ;;  %p1675_p11 = scmp.ne.s32.totalorder %s2128_s25, %s1674_s14  ;;  %p2206_p0 = scmp.ne.s32.totalorder %s2199_s26, 0 }
  0x70   : > { %1391 = vmatpush3.bf16.msra.mxu0 %v1533_v1  ;;  %v408_v25 = vadd.f32 %v1280_v9, %v397_v22  ;;  %1408 = vmatprep.subr.bf16.mxu1 %v1540_v29  ;;  %v1543_v32 = vld [vmem:[%s2182_s5 + $0x38] sm:$0xff]   ;;  %v2063_v33 = vld [vmem:[%s2182_s5] sm:$0xff]   ;;  %s1752_s22 = smov [#allocation8]  }
  0x71   : > { %1392 = vmatprep.subr.bf16.mxu0 %v1534_v2  ;;  %v409_v14 = vmax.f32 %v405_v12, 0.0  ;;  %v410_v15 = vmax.f32 %v406_v13, 0.0  ;;  %v411_v26 = vmax.f32 %v407_v24, 0.0  ;;  %1409 = vmatpush3.bf16.msra.mxu1 %v1540_v29  ;;  %v1552_v34 = vld [vmem:[#allocation7] ss:$8 sps:$4 sm:$0xff]   ;;  %p1676_p2 = pnand %p1675_p11, %p2206_p0  ;;  %s1678_s28 = sshll.u32 %s1752_s22, 4  ;;  %s1679_s28 = int_to_ptr.vmem [resolvable:$false] %s1678_s28 }
  0x72   : > { %v412_v27 = vmax.f32 %v408_v25, 0.0  ;;  %1410 = vmatprep.subr.bf16.mxu1 %v1541_v30  ;;  %v1554_v35 = vld [vmem:[#allocation7 + $0x4] ss:$8 sps:$4 sm:$0xff]   ;;  %v1557_v36 = vld [vmem:[#allocation7 + $0x14] ss:$8 sps:$4 sm:$0xff]   ;;  %s1680_s29 = scalar_lea.vmem %s1679_s28, 2048  ;;  %p1681_p7 = scmp.lt.s32.totalorder %s2128_s25, %s1679_s28 }
  0x73   : > { %v413_v19 = vpack.c.bf16 %v410_v15, %v409_v14  ;;  %v1555_v37 = vld [vmem:[#allocation7 + $0x10] ss:$8 sps:$4 sm:$0xff]   ;;  %v1560_v38 = vld [vmem:[#allocation7 + $0x24] ss:$8 sps:$4 sm:$0xff]   ;;  %v1558_v39 = vld [vmem:[#allocation7 + $0x20] ss:$8 sps:$4 sm:$0xff]   ;;  %p1677_p3 = pneg %p1676_p2  ;;  %p1682_p9 = scmp.lt.s32.totalorder %s1680_s29, %s1674_s14 }
  0x74   : > { %1393 = vmatpush3.bf16.msra.mxu0 %v1534_v2  ;;  %v414_v28 = vpack.c.bf16 %v412_v27, %v411_v26  ;;  %v1563_v40 = vld [vmem:[#allocation7 + $0x34] ss:$8 sps:$4 sm:$0xff]   ;;  %v1561_v41 = vld [vmem:[#allocation7 + $0x30] ss:$8 sps:$4 sm:$0xff]   ;;  %v1566_v42 = vld [vmem:[#allocation7 + $0x44] ss:$8 sps:$4 sm:$0xff]  }
  0x75   : > { %1394 = vmatprep.subr.bf16.mxu0 %v1535_v3  ;;  %1404 = vmatprep.mubr.bf16.mxu0 %v413_v19  ;;  %v1564_v43 = vld [vmem:[#allocation7 + $0x40] ss:$8 sps:$4 sm:$0xff]   ;;  %v1572_v44 = vld [vmem:[#allocation7 + $0x54] ss:$8 sps:$4 sm:$0xff]   ;;  %v1570_v45 = vld [vmem:[#allocation7 + $0x50] ss:$8 sps:$4 sm:$0xff]   ;;  %p1683_p12 = por %p1682_p9, %p1681_p7 }
  0x76   : > { %1411 = vmatpush3.bf16.msra.mxu1 %v1541_v30  ;;  %v1578_v46 = vld [vmem:[#allocation7 + $0x64] ss:$8 sps:$4 sm:$0xff]   ;;  %v1576_v47 = vld [vmem:[#allocation7 + $0x60] ss:$8 sps:$4 sm:$0xff]  }
  0x77   : > { %1412 = vmatprep.subr.bf16.mxu1 %v1542_v31  ;;  %v1281_v48 = vld [vmem:[%s2181_s4] ss:$0 sm:$0xff]  ;;  %p1684_p1 = pnand %p1683_p12, %p1677_p3 }
  0x78   : > { %1395 = vmatpush3.bf16.msra.mxu0 %v1535_v3 }
  0x79   : > { %1396 = vmatprep.subr.bf16.mxu0 %v1536_v11 }
  0x7a   : > { %1413 = vmatpush3.bf16.msra.mxu1 %v1542_v31 }
  0x7b   : > { %1414 = vmatprep.subr.bf16.mxu1 %v1543_v32 }
  0x7c   : > { %1397 = vmatpush3.bf16.msra.mxu0 %v1536_v11 }
  0x7d   : > { %1398 = vmatprep.subr.bf16.mxu0 %v1537_v17 }
  0x7e   : > { %1415 = vmatpush3.bf16.msra.mxu1 %v1543_v32 }
  0x7f   : > { %1420 = vmatprep.subr.bf16.mxu1 %v2063_v33 }
  0x80   : > { %1399 = vmatpush3.bf16.msra.mxu0 %v1537_v17 }
  0x81   : > { %1400 = vmatprep.subr.bf16.mxu0 %v1538_v20 }
  0x84   : > { %1401 = vmatpush3.bf16.msra.mxu0 %v1538_v20 }
  0x85   : > { %1402 = vmatprep.subr.bf16.mxu0 %v1539_v23 }
  0x88   : > { %1403 = vmatpush3.bf16.msra.mxu0 %v1539_v23 }
  0x89   : > { %999 = vmatprep.subr.bf16.mxu0 %v1554_v35 }
  0x8b   : > { %1405 = vmatmul.mubr.bf16.vlgmr.msra.gmra.mrb[0].mxu0 %v414_v28 }
  0x8c   : > { %1000 = vmatpush1.bf16.msra.mxu0 %v1552_v34 }
  0x8d   : > { %1001 = vmatprep.subr.bf16.mxu0 %v1557_v36 }
  0x90   : > { %1002 = vmatpush1.bf16.msra.mxu0 %v1555_v37 }
  0x91   : > { %1003 = vmatprep.subr.bf16.mxu0 %v1560_v38 }
  0x94   : > { %1004 = vmatpush1.bf16.msra.mxu0 %v1558_v39 }
  0x95   : > { %1005 = vmatprep.subr.bf16.mxu0 %v1563_v40 }
  0x98   : > { %1006 = vmatpush1.bf16.msra.mxu0 %v1561_v41 }
  0x99   : > { %1007 = vmatprep.subr.bf16.mxu0 %v1566_v42 }
  0x9c   : > { %1008 = vmatpush1.bf16.msra.mxu0 %v1564_v43 }
  0x9d   : > { %1009 = vmatprep.subr.bf16.mxu0 %v1572_v44  ;;  %v1545_v44 = vld [vmem:[%s2182_s5 + $0x8] sm:$0xff]  }
  0xa0   : > { %1010 = vmatpush1.bf16.msra.mxu0 %v1570_v45 }
  0xa1   : > { %1011 = vmatprep.subr.bf16.mxu0 %v1578_v46  ;;  %v1546_v46 = vld [vmem:[%s2182_s5 + $0x10] sm:$0xff]  }
  0xa4   : > { %1012 = vmatpush1.bf16.msra.mxu0 %v1576_v47  ;;  %v1547_v47 = vld [vmem:[%s2182_s5 + $0x18] sm:$0xff]  }
 0x15e   : > { %v1406_v49 = vpop.f32.mrb[0].mxu0 }
 0x15f   : > { %v529_v50 = vadd.f32 %v1406_v49, %v1281_v48  ;;  %v520_v51 = vpop.f32.mrb[1].mxu0  ;;  %v1550_v49 = vld [vmem:[%s2182_s5 + $0x50] sm:$0xff]  }
 0x160   : > { %v521_v52 = vadd.f32 %v1281_v48, %v520_v51  ;;  %v1407_v53 = vpop.f32.mrb[2].mxu0  ;;  %v1569_v51 = vld [vmem:[#allocation5 + $0x4] ss:$8 sps:$4 sm:$0xff]  }
 0x161   : > { %v537_v54 = vmax.f32 %v529_v50, 0.0  ;;  %v532_v55 = vadd.f32 %v1407_v53, %v1281_v48  ;;  %v523_v56 = vpop.f32.mrb[3].mxu0  ;;  %v1551_v50 = vld [vmem:[%s2182_s5 + $0x58] sm:$0xff]  }
 0x162   : > { %v535_v57 = vmax.f32 %v521_v52, 0.0  ;;  %v524_v58 = vadd.f32 %v1281_v48, %v523_v56  ;;  %v1548_v48 = vld [vmem:[%s2182_s5 + $0x40] sm:$0xff]   ;;  %v1575_v53 = vld [vmem:[#allocation5 + $0x14] ss:$8 sps:$4 sm:$0xff]  }
 0x163   : > { %v545_v59 = vrot.slane %v537_v54, 7  ;;  %v538_v60 = vmax.f32 %v532_v55, 0.0  ;;  %v1567_v52 = vld [vmem:[#allocation5] ss:$8 sps:$4 sm:$0xff]   ;;  %v1573_v54 = vld [vmem:[#allocation5 + $0x10] ss:$8 sps:$4 sm:$0xff]  }
 0x164   : > { %v543_v61 = vrot.slane %v535_v57, 7  ;;  %v536_v1 = vmax.f32 %v524_v58, 0.0  ;;  %v1581_v55 = vld [vmem:[#allocation5 + $0x24] ss:$8 sps:$4 sm:$0xff]   ;;  %v1579_v56 = vld [vmem:[#allocation5 + $0x20] ss:$8 sps:$4 sm:$0xff]  }
 0x165   : > { %v554_v62 = vsel %vm551_vm0, 0.0, %v545_v59  ;;  %v558_v63 = vsel %vm551_vm0, %v545_v59, 0.0  ;;  %v546_v0 = vrot.slane %v538_v60, 7  ;;  %v1584_v57 = vld [vmem:[#allocation7 + $0x74] ss:$8 sps:$4 sm:$0xff]  }
 0x166   : > { %v585_v2 = vrot.slane %v554_v62, 1  ;;  %v586_v3 = vrot.slane %v558_v63, 1  ;;  %v772_v6 = vrot.slane %v554_v62, 2  ;;  %v773_v7 = vrot.slane %v558_v63, 2  ;;  %v1582_v58 = vld [vmem:[#allocation7 + $0x70] ss:$8 sps:$4 sm:$0xff]   ;;  %1013 = vmatprep.subr.bf16.mxu0 %v1584_v57 }
 0x167   : > { %v552_v8 = vsel %vm551_vm0, 0.0, %v543_v61  ;;  %v556_v9 = vsel %vm551_vm0, %v543_v61, 0.0  ;;  %v555_v11 = vsel %vm551_vm0, 0.0, %v546_v0  ;;  %v559_v12 = vsel %vm551_vm0, %v546_v0, 0.0  ;;  %1014 = vmatpush1.bf16.msra.mxu0 %v1582_v58  ;;  %v1587_v59 = vld [vmem:[#allocation5 + $0x34] ss:$8 sps:$4 sm:$0xff]  }
 0x168   : > { %v2076_v13 = vsel %vm765_vm1, %v772_v6, %v773_v7  ;;  %v579_v14 = vrot.slane %v552_v8, 1  ;;  %v561_v15 = vpack.c.bf16 %v555_v11, %v554_v62  ;;  %v588_v17 = vrot.slane %v555_v11, 1  ;;  %v1585_v60 = vld [vmem:[#allocation5 + $0x30] ss:$8 sps:$4 sm:$0xff]   ;;  %v1324_v63 = vld [vmem:[%s2183_s6] ss:$0 sm:$0xff] }
 0x169   : > { %v589_v19 = vrot.slane %v559_v12, 1  ;;  %v580_v20 = vrot.slane %v556_v9, 1  ;;  %v775_v21 = vrot.slane %v555_v11, 2  ;;  %v776_v22 = vrot.slane %v559_v12, 2 }
 0x16a   : > { %v544_v23 = vrot.slane %v536_v1, 7  ;;  %v766_v24 = vrot.slane %v552_v8, 2  ;;  %v767_v25 = vrot.slane %v556_v9, 2  ;;  %v587_v26 = vsel %vm578_vm2, %v585_v2, %v586_v3 }
 0x16b   : > { %v590_v27 = vsel %vm578_vm2, %v588_v17, %v589_v19  ;;  %v777_v28 = vsel %vm765_vm1, %v775_v21, %v776_v22  ;;  %v581_v39 = vsel %vm578_vm2, %v579_v14, %v580_v20  ;;  %v1751_v61 = vmov 0  }
 0x16c   : > { %v553_v29 = vsel %vm551_vm0, 0.0, %v544_v23  ;;  %v557_v30 = vsel %vm551_vm0, %v544_v23, 0.0  ;;  %v596_v31 = vpack.c.bf16 %v590_v27, %v587_v26  ;;  %v783_v32 = vpack.c.bf16 %v777_v28, %v2076_v13  ;;  %1031 = vmatprep.mubr.bf16.mxu0 %v1751_v61 }
 0x16d   : > { %v560_v34 = vpack.c.bf16 %v553_v29, %v552_v8  ;;  %v582_v35 = vrot.slane %v553_v29, 1  ;;  %v583_v36 = vrot.slane %v557_v30, 1  ;;  %v769_v37 = vrot.slane %v553_v29, 2  ;;  %1032 = vmatmul.mubr.bf16.vlgmr.msra.gmra.mrb[4].mxu0 %v901_v10 }
 0x16e   : > { %v770_v38 = vrot.slane %v557_v30, 2  ;;  %v768_v42 = vsel %vm765_vm1, %v766_v24, %v767_v25  ;;  %1041 = vmatprep.mubr.bf16.mxu0 %v1751_v61  ;;  %v902_v62 = vpack.c.bf16 %v2038_v18, %v2032_v16 }
 0x16f   : > { %v584_v40 = vsel %vm578_vm2, %v582_v35, %v583_v36 }
 0x170   : > { %v595_v41 = vpack.c.bf16 %v584_v40, %v581_v39  ;;  %v771_v43 = vsel %vm765_vm1, %v769_v37, %v770_v38 }
 0x171   : > { %v782_v45 = vpack.c.bf16 %v771_v43, %v768_v42 }
 0x172   : > { %1416 = vmatprep.mubr.msk.bf16.mxu1 %vm630_vm3, %v595_v41 }
 0x173   : > { %1417 = vmatmul.mubr.msk.bf16.vlgmr.msra.gmra.mrb[0].mxu1 %vm630_vm3, %v596_v31 }
 0x174   : > { %1421 = vmatpush3.bf16.msra.mxu1 %v2063_v33  ;;  %1428 = vmatprep.mubr.msk.bf16.mxu1 %vm630_vm3, %v560_v34  ;;  %v1549_v33 = vld [vmem:[%s2182_s5 + $0x48] sm:$0xff]  }
 0x175   : > { %1422 = vmatprep.subr.bf16.mxu1 %v1545_v44  ;;  %1042 = vmatmul.mubr.bf16.gmra.mrb[8].mxu0 %v902_v62 }
 0x178   : > { %1423 = vmatpush3.bf16.msra.mxu1 %v1545_v44 }
 0x179   : > { %1424 = vmatprep.subr.bf16.mxu1 %v1546_v46 }
 0x17c   : > { %1425 = vmatpush3.bf16.msra.mxu1 %v1546_v46 }
 0x17d   : > { %1426 = vmatprep.subr.bf16.mxu1 %v1547_v47 }
 0x180   : > { %1427 = vmatpush3.bf16.msra.mxu1 %v1547_v47 }
 0x181   : > { %1432 = vmatprep.subr.bf16.mxu1 %v1548_v48 }
 0x183   : > { %1429 = vmatmul.mubr.msk.bf16.vlgmr.msra.gmra.mrb[0].mxu1 %vm630_vm3, %v561_v15 }
 0x184   : > { %1433 = vmatpush3.bf16.msra.mxu1 %v1548_v48  ;;  %1440 = vmatprep.mubr.msk.bf16.mxu1 %vm630_vm3, %v782_v45 }
 0x185   : > { %1434 = vmatprep.subr.bf16.mxu1 %v1549_v33 }
 0x188   : > { %1435 = vmatpush3.bf16.msra.mxu1 %v1549_v33 }
 0x189   : > { %1436 = vmatprep.subr.bf16.mxu1 %v1550_v49 }
 0x18c   : > { %1437 = vmatpush3.bf16.msra.mxu1 %v1550_v49 }
 0x18d   : > { %1438 = vmatprep.subr.bf16.mxu1 %v1551_v50 }
 0x190   : > { %1439 = vmatpush3.bf16.msra.mxu1 %v1551_v50 }
 0x191   : > { %1098 = vmatprep.subr.bf16.mxu1 %v1569_v51 }
 0x193   : > { %1441 = vmatmul.mubr.msk.bf16.vlgmr.msra.gmra.mrb[0].mxu1 %vm630_vm3, %v783_v32 }
 0x194   : > { %1099 = vmatpush1.bf16.msra.mxu1 %v1567_v52  ;;  %1130 = vmatprep.mubr.bf16.mxu1 %v1751_v61 }
 0x195   : > { %1100 = vmatprep.subr.bf16.mxu1 %v1575_v53 }
 0x198   : > { %1101 = vmatpush1.bf16.msra.mxu1 %v1573_v54 }
 0x199   : > { %1102 = vmatprep.subr.bf16.mxu1 %v1581_v55 }
 0x19c   : > { %1103 = vmatpush1.bf16.msra.mxu1 %v1579_v56 }
 0x19d   : > { %1104 = vmatprep.subr.bf16.mxu1 %v1587_v59 }
 0x1a0   : > { %1105 = vmatpush1.bf16.msra.mxu1 %v1585_v60 }
 0x240   : > { %v1033_v18 = vpop.f32.mrb[4].mxu0 }
 0x241   : > { %v1035_v13 = vpop.f32.mrb[5].mxu0 }
 0x242   : > { %v1037_v14 = vpop.f32.mrb[6].mxu0 }
 0x243   : > { %v1039_v15 = vpop.f32.mrb[7].mxu0 }
 0x248   : > { %v1043_v17 = vpop.f32.mrb[8].mxu0 }
 0x249   : > { %v1045_v19 = vpop.f32.mrb[9].mxu0 }
 0x24a   : > { %v1047_v20 = vpop.f32.mrb[10].mxu0 }
 0x24b   : > { %v1049_v21 = vpop.f32.mrb[11].mxu0 }
 0x266   : > { %v1442_v0 = vpop.f32.mrb[0].mxu1 }
 0x267   : > { %v885_v1 = vadd.f32 %v1442_v0, %v1324_v63  ;;  %v857_v2 = vpop.f32.mrb[1].mxu1 }
 0x268   : > { %v883_v3 = vadd.f32 %v1324_v63, %v857_v2  ;;  %v1443_v6 = vpop.f32.mrb[2].mxu1 }
 0x269   : > { %v886_v7 = vadd.f32 %v1443_v6, %v1324_v63  ;;  %v860_v8 = vpop.f32.mrb[3].mxu1  ;;  %v889_v5 = vmax.f32 %v885_v1, 0.0 }
 0x26a   : > { %v884_v4 = vadd.f32 %v1324_v63, %v860_v8  ;;  %v887_v9 = vmax.f32 %v883_v3, 0.0 }
 0x26b   : > { %v890_v10 = vmax.f32 %v886_v7, 0.0 }
 0x26c   : > { %v888_v11 = vmax.f32 %v884_v4, 0.0 }
 0x26d   : > { %v892_v12 = vpack.c.bf16 %v890_v10, %v889_v5 }
 0x26e   : > { %v891_v16 = vpack.c.bf16 %v888_v11, %v887_v9 }
 0x270   : > { %1349 = vmatmul.mubr.msk.bf16.vlgmr.msra.gmra.mrb[4].mxu1 %vm630_vm3, %v891_v16 }
 0x271   : > { %1140 = vmatprep.mubr.bf16.mxu1 %v1751_v61 }
 0x278   : > { %1350 = vmatmul.mubr.msk.bf16.gmra.mrb[8].mxu1 %vm630_vm3, %v892_v12 }
 0x343   : > { %v1132_v22 = vpop.f32.mrb[4].mxu1 }
 0x344   : > { %v1133_v23 = vadd.f32 %v1132_v22, %v1033_v18  ;;  %v1134_v24 = vpop.f32.mrb[5].mxu1 }
 0x345   : > { %v1135_v25 = vadd.f32 %v1134_v24, %v1035_v13  ;;  %v1136_v26 = vpop.f32.mrb[6].mxu1 }
 0x346   : > { %1151 = vst [vmem:[%s379_s16] sm:$0xff] %v1133_v23  ;;  %v1137_v27 = vadd.f32 %v1136_v26, %v1037_v14  ;;  %v1138_v28 = vpop.f32.mrb[7].mxu1 }
 0x347   : > { %1152 = vst [vmem:[%s379_s16 + $0x8] sm:$0xff] %v1135_v25  ;;  %v1139_v29 = vadd.f32 %v1138_v28, %v1039_v15 }
 0x348   : > { %1153 = vst [vmem:[%s379_s16 + $0x10] sm:$0xff] %v1137_v27 }
 0x349   : > { %1154 = vst [vmem:[%s379_s16 + $0x18] sm:$0xff] %v1139_v29 }
 0x34b   : > { %v1142_v30 = vpop.f32.mrb[8].mxu1 }
 0x34c   : > { %v1143_v31 = vadd.f32 %v1142_v30, %v1043_v17  ;;  %v1144_v32 = vpop.f32.mrb[9].mxu1 }
 0x34d   : > { %v1145_v34 = vadd.f32 %v1144_v32, %v1045_v19  ;;  %v1146_v35 = vpop.f32.mrb[10].mxu1 }
 0x34e   : > { %1155 = vst [vmem:[%s379_s16 + $0x20] sm:$0xff] %v1143_v31  ;;  %v1147_v36 = vadd.f32 %v1146_v35, %v1047_v20  ;;  %v1148_v37 = vpop.f32.mrb[11].mxu1 }
 0x34f   : > { %1156 = vst [vmem:[%s379_s16 + $0x28] sm:$0xff] %v1145_v34  ;;  %v1149_v38 = vadd.f32 %v1148_v37, %v1049_v21 }
 0x350   : > { %1157 = vst [vmem:[%s379_s16 + $0x30] sm:$0xff] %v1147_v36 }
 0x351   : > { %1158 = vst [vmem:[%s379_s16 + $0x38] sm:$0xff] %v1149_v38 }
 0x352   : > { %1687 = shalt.err (!%p1684_p1)
}
 0x353   : > { %s1688_s17 = scalar_lea.hbm %s2133_s21, 1024  ;;  %s1692_s15 = scalar_lea.hbm %s2186_s9, 2048 }
 0x354   : > { %p1689_p13 = scmp.ne.s32.totalorder %s2133_s21, %s1688_s17  ;;  %p1693_p4 = scmp.lt.u32.totalorder %s2133_s21, %s2186_s9 }
 0x355   : > { %p1694_p5 = scmp.lt.u32.totalorder %s1692_s15, %s1688_s17  ;;  %p1696_p11 = scmp.lt.u32.totalorder %s1688_s17, %s2133_s21 }
 0x356   : > { %p1690_p6 = pnand %p1689_p13, %p2206_p0 }
 0x357   : > { %p1695_p8 = por %p1694_p5, %p1693_p4 }
 0x358   : > { %p1691_p10 = pneg %p1690_p6 }
 0x359   : > { %p1697_p2 = por %p1696_p11, %p1695_p8 }
 0x35b   : > { %p1698_p3 = pnand %p1697_p2, %p1691_p10 }
 0x35d   : > { %1701 = shalt.err (!%p1698_p3)
}
 0x35e   : > { %s1753_s14 = smov 256   ;;  %s1754_s22 = smov 16  }
 0x35f   : > { %1470 = dma.vmem_to_hbm [thread:$0]  (%p2206_p0), %s2128_s25, 1024, %s2133_s21, %s1160_s13, %s1753_s14, %s1753_s14, %s1754_s22  }
 0x360 PF: > { %s2207_s28 = sld [smem:[#allocation12_spill]]  ;;  %s1189_s29 = sand.u32 1, %s1732_s30  }
 0x361   : > { %p2209_p9 = scmp.ge.s32.totalorder %s1744_s12, 2  ;;  %s1190_s17 = scalar_lea.sflag [#allocation4], %s1189_s29 }
 0x366   : > { %p2208_p7 = scmp.ne.s32.totalorder %s2207_s28, 0 }
 0x368   : > { %p1484_p12 = pnand %p2209_p9, %p2208_p7 }
 0x36a   : > { %1727 = dma.done.wait (!%p1484_p12), %s1190_s17, 1024  }
 0x36b   : > { %1729 = vsyncadd (!%p1484_p12), %s1190_s17, 4294966272  ;;  %p23_p1 = scmp.ge.s32.totalorder %s1921_s20, 4   ;;  %s2210_s30 = smov %s1736_s10 }
 0x36c   : > { %s2211_s10 = smov %s1740_s11  ;;  %s2212_s11 = smov %s1937_s27 }
 0x36d   : > { %s2213_s12 = smov %s1921_s20  ;;  %25 = sbr.rel (!%p23_p1) target bundleno = 6 (0x6), region = 111 }
 0x374   :  { %1195 = vsyncpa [#allocation3], 1 }
 0x375   :  { %1197 = vsyncpa [#allocation3 + $0x1], 1 }
 0x376   :  { %1198 = vsyncpa [#allocation6], 1 }
 0x377   :  { %1199 = vsyncpa [#allocation4], 1 }
 0x378   :  { %1201 = vsyncpa [#allocation4 + $0x1], 1 }

</bundles_post_ra>
